<compile_context>
chip_gen: v7x
topology: tpu7x:2x2x1
jax: 0.10.0
libtpu: 0.0.40
codegen_flags: <defaults>
</compile_context>

<pallas_src>
import functools
import math

import jax
import jax.numpy as jnp
import numpy as np
from jax import lax
from jax.experimental import pallas as pl
from jax.experimental.pallas import tpu as pltpu


def transformer_block_kernel(x_ref, wk_ref, wvo_ref, w1_ref, w2_ref, o_ref,
                             *, scale):
    """One batch element per grid step.  x_ref: (Sp, Dp) f32, weights bf16."""
    x = x_ref[...]                                   # (Sp, Dp) f32
    xb = x.astype(jnp.bfloat16)                      # bf16 operand for the MXU

    # --- Attention (single head, wq = Identity, wv/wo folded into wvo) ---
    k = jnp.dot(xb, wk_ref[...], preferred_element_type=jnp.float32)   # (Sp, Dp)
    v = jnp.dot(xb, wvo_ref[...], preferred_element_type=jnp.float32)  # (Sp, Dp)

    # q . k^T (contract last dims, no materialized transpose), then scale.
    scores = lax.dot_general(xb, k.astype(jnp.bfloat16),
                             (((1,), (1,)), ((), ())),
                             preferred_element_type=jnp.float32) * scale

    # Causal mask generated in-kernel (pure VPU work, no mask DMA).
    # Padded rows (>= true seq len) still attend to themselves -> no NaN rows;
    # real rows never see padded key columns (those lie above the diagonal).
    sp = scores.shape[0]
    rows = lax.broadcasted_iota(jnp.int32, (sp, sp), 0)
    cols = lax.broadcasted_iota(jnp.int32, (sp, sp), 1)
    scores = jnp.where(rows >= cols, scores, -jnp.inf)

    # Numerically stable softmax in f32 (EUP reciprocal -> free slot).
    scores = scores - jnp.max(scores, axis=-1, keepdims=True)
    p = jnp.exp(scores)
    p = p * pl.reciprocal(jnp.sum(p, axis=-1, keepdims=True), approx=True)

    attn = jnp.dot(p.astype(jnp.bfloat16), v.astype(jnp.bfloat16),
                   preferred_element_type=jnp.float32)                 # (Sp, Dp)

    # --- Residual + FeedForward (w1 -> ReLU -> w2); residual/ReLU in f32 ---
    h = x + attn
    ff = jnp.dot(h.astype(jnp.bfloat16), w1_ref[...],
                 preferred_element_type=jnp.float32)
    ff = jnp.maximum(ff, 0.0)
    ff = jnp.dot(ff.astype(jnp.bfloat16), w2_ref[...],
                 preferred_element_type=jnp.float32)

    o_ref[...] = (h + ff).astype(o_ref.dtype)


def _round_up(n, m):
    return ((n + m - 1) // m) * m


def transformer_block(x, mask, wk, wv, wo, w1, w2):
    """Fused TransformerBlock forward.

    `mask` is accepted for API parity with the PyTorch forward; the kernel
    regenerates the standard causal mask internally (see perf notes above).
    """
    # TODO(synk): arbitrary / per-batch masks would need to be passed to the
    # kernel as an (S, S) input block instead of the in-kernel iota mask.
    del mask
    B, S, D = x.shape
    H = w1.shape[0]
    Sp = _round_up(max(S, 8), 8)          # sublane-aligned sequence length
    Dp = _round_up(max(D, 128), 128)      # lane-dense embedding dim
    Hp = _round_up(max(H, 128), 128)      # lane-dense FFN hidden dim

    # Zero-pad activations (padded rows/cols never affect the kept outputs).
    x_p = jnp.pad(x, ((0, 0), (0, Sp - S), (0, Dp - D)))

    # PyTorch-style (out, in) weights -> (in, out), zero-pad, store as bf16.
    def prep(w_t, rows, cols):
        w_t = jnp.pad(w_t, ((0, rows - w_t.shape[0]), (0, cols - w_t.shape[1])))
        return w_t.astype(jnp.bfloat16)

    wk_t = prep(wk.T, Dp, Dp)
    # Fold wv and wo:  (x Wv^T) Wo^T == x (Wv^T Wo^T)   (exact by associativity)
    wvo_t = prep(wv.T @ wo.T, Dp, Dp)
    w1_t = prep(w1.T, Dp, Hp)
    w2_t = prep(w2.T, Hp, Dp)

    flops = B * (4 * Sp * Dp * Dp + 4 * Sp * Sp * Dp + 4 * Sp * Dp * Hp)
    bytes_accessed = (8 * B * Sp * Dp                       # x in + out (f32)
                      + 2 * (2 * Dp * Dp + 2 * Dp * Hp))    # bf16 weights
    transcendentals = B * (Sp * Sp + Sp)

    # Per-generation VMEM budget: ~3/4 of physical, capped for v5e/v6e.
    try:
        vmem_cap = pltpu.get_tpu_info().vmem_capacity_bytes
    except Exception:
        vmem_cap = 64 * 1024 * 1024       # conservative (v7x-sized) fallback
    vmem_limit = int(min((vmem_cap * 3) // 4, 100 * 1024 * 1024))

    # Weights use a constant index_map -> DMA'd once, resident across steps.
    # TODO(synk): at production D/H, tile the FFN hidden dim (accumulator grid
    # axis), add a q-row tile axis (256-multiples on v6e/v7x, 128 on v5e), and
    # single-buffer the resident weights (pipeline_mode=pl.Buffered(1)).
    out = pl.pallas_call(
        functools.partial(transformer_block_kernel, scale=1.0 / math.sqrt(D)),
        out_shape=jax.ShapeDtypeStruct((B, Sp, Dp), x.dtype),
        grid_spec=pltpu.PrefetchScalarGridSpec(
            num_scalar_prefetch=0,
            grid=(B,),
            in_specs=[
                pl.BlockSpec((None, Sp, Dp), lambda b: (b, 0, 0)),  # x[b]
                pl.BlockSpec((Dp, Dp), lambda b: (0, 0)),           # Wk^T
                pl.BlockSpec((Dp, Dp), lambda b: (0, 0)),           # Wv^T Wo^T
                pl.BlockSpec((Dp, Hp), lambda b: (0, 0)),           # W1^T
                pl.BlockSpec((Hp, Dp), lambda b: (0, 0)),           # W2^T
            ],
            out_specs=pl.BlockSpec((None, Sp, Dp), lambda b: (b, 0, 0)),
        ),
        compiler_params=pltpu.CompilerParams(
            dimension_semantics=("parallel",),    # v7x: 2 TCs split the batch
            vmem_limit_bytes=vmem_limit),
        cost_estimate=pl.CostEstimate(flops=flops,
                                      bytes_accessed=bytes_accessed,
                                      transcendentals=transcendentals),
    )(x_p, wk_t, wvo_t, w1_t, w2_t)

    return out[:, :S, :D]


def reference_block(x, mask, wk, wv, wo, w1, w2):
    # Pure-JAX reference, mirrors the PyTorch semantics exactly (all f32).
    D = x.shape[-1]
    q = x
    k = x @ wk.T
    v = x @ wv.T
    scores = (q @ jnp.swapaxes(k, -1, -2)) / math.sqrt(D) + mask
    p = jax.nn.softmax(scores, axis=-1)
    attn = (p @ v) @ wo.T
    h = x + attn
    ff = jax.nn.relu(h @ w1.T) @ w2.T
    return h + ff


if __name__ == "__main__":
    B, S, D = 2, 8, 32
    mlp_multiplier = 4
    H = mlp_multiplier * D

    key = jax.random.PRNGKey(0)
    kx, kk, kv, ko, k1, k2 = jax.random.split(key, 6)

    x = jax.random.normal(kx, (B, S, D), dtype=jnp.float32)

    # Deterministic "nn.Linear"-like init (uniform(-1/sqrt(fan_in), 1/sqrt(fan_in)))
    def linear_init(k, out_f, in_f):
        bound = 1.0 / math.sqrt(in_f)
        return jax.random.uniform(k, (out_f, in_f), jnp.float32, -bound, bound)

    wk = linear_init(kk, D, D)
    wv = linear_init(kv, D, D)
    wo = linear_init(ko, D, D)
    w1 = linear_init(k1, H, D)
    w2 = linear_init(k2, D, H)

    # Causal attention mask: 0 on/below diagonal, -inf above (used by reference).
    causal = jnp.tril(jnp.ones((S, S), dtype=bool))
    mask = jnp.where(causal, 0.0, -jnp.inf).astype(jnp.float32)

    out = transformer_block(x, mask, wk, wv, wo, w1, w2)
    out = jax.block_until_ready(out)

    ref = reference_block(x, mask, wk, wv, wo, w1, w2)
    # bf16 MXU operands -> tolerance loosened vs. the pure-f32 version.
    np.testing.assert_allclose(np.asarray(out), np.asarray(ref),
                               rtol=3e-2, atol=3e-2)

    print("KERNEL_OK")
</pallas_src>

<mosaic_0001>
module attributes {stable_mosaic.version = 11 : i64} {
  func.func @transformer_block_kernel(%arg0: i32, %arg1: memref<1x8x128xf32, #tpu.memory_space<vmem>>, %arg2: memref<128x128xbf16, #tpu.memory_space<vmem>>, %arg3: memref<128x128xbf16, #tpu.memory_space<vmem>>, %arg4: memref<128x128xbf16, #tpu.memory_space<vmem>>, %arg5: memref<128x128xbf16, #tpu.memory_space<vmem>>, %arg6: memref<1x8x128xf32, #tpu.memory_space<vmem>>) attributes {dimension_semantics = [#tpu.dimension_semantics<parallel>], iteration_bounds = array<i64: 2>, scalar_prefetch = 0 : i64, scratch_operands = 0 : i64, tpu.core_type = #tpu.core_type<tc>, window_params = [{transform_indices = @transform_0, window_bounds = array<i64: 1, 8, 128>}, {pipeline_mode = #tpu.pipeline_mode<synchronous>, transform_indices = @transform_1, window_bounds = array<i64: 128, 128>}, {pipeline_mode = #tpu.pipeline_mode<synchronous>, transform_indices = @transform_2, window_bounds = array<i64: 128, 128>}, {pipeline_mode = #tpu.pipeline_mode<synchronous>, transform_indices = @transform_3, window_bounds = array<i64: 128, 128>}, {pipeline_mode = #tpu.pipeline_mode<synchronous>, transform_indices = @transform_4, window_bounds = array<i64: 128, 128>}, {transform_indices = @transform_5, window_bounds = array<i64: 1, 8, 128>}]} {
    %c0 = arith.constant 0 : index
    %c0_0 = arith.constant 0 : index
    %c0_1 = arith.constant 0 : index
    %0 = vector.load %arg1[%c0, %c0_0, %c0_1] : memref<1x8x128xf32, #tpu.memory_space<vmem>>, vector<1x8x128xf32>
    %1 = vector.shape_cast %0 : vector<1x8x128xf32> to vector<8x128xf32>
    %2 = arith.truncf %1 : vector<8x128xf32> to vector<8x128xbf16>
    %c0_2 = arith.constant 0 : index
    %c0_3 = arith.constant 0 : index
    %3 = vector.load %arg2[%c0_2, %c0_3] : memref<128x128xbf16, #tpu.memory_space<vmem>>, vector<128x128xbf16>
    %cst = arith.constant dense<0.000000e+00> : vector<8x128xf32>
    %4 = tpu.matmul %2, %3, %cst {dimension_numbers = #tpu.dot_dimension_numbers<[1], [0], [0], [1], [0, 0, 1, 1], [], []>} : vector<8x128xbf16>, vector<128x128xbf16>, vector<8x128xf32> -> vector<8x128xf32>
    %c0_4 = arith.constant 0 : index
    %c0_5 = arith.constant 0 : index
    %5 = vector.load %arg3[%c0_4, %c0_5] : memref<128x128xbf16, #tpu.memory_space<vmem>>, vector<128x128xbf16>
    %cst_6 = arith.constant dense<0.000000e+00> : vector<8x128xf32>
    %6 = tpu.matmul %2, %5, %cst_6 {dimension_numbers = #tpu.dot_dimension_numbers<[1], [0], [0], [1], [0, 0, 1, 1], [], []>} : vector<8x128xbf16>, vector<128x128xbf16>, vector<8x128xf32> -> vector<8x128xf32>
    %7 = arith.truncf %4 : vector<8x128xf32> to vector<8x128xbf16>
    %cst_7 = arith.constant dense<0.000000e+00> : vector<8x8xf32>
    %8 = tpu.matmul %2, %7, %cst_7 {dimension_numbers = #tpu.dot_dimension_numbers<[1], [1], [0], [0], [0, 0, 1, 0], [], []>} : vector<8x128xbf16>, vector<8x128xbf16>, vector<8x8xf32> -> vector<8x8xf32>
    %cst_8 = arith.constant 0.176776692 : f32
    %9 = vector.broadcast %cst_8 : f32 to vector<8x8xf32>
    %10 = arith.mulf %8, %9 : vector<8x8xf32>
    %11 = tpu.iota {dimensions = array<i32: 0>} : vector<8x8xi32>
    %12 = tpu.iota {dimensions = array<i32: 1>} : vector<8x8xi32>
    %13 = arith.cmpi sge, %11, %12 : vector<8x8xi32>
    %cst_9 = arith.constant 0xFF800000 : f32
    %14 = vector.broadcast %cst_9 : f32 to vector<8x8xf32>
    %15 = arith.select %13, %10, %14 : vector<8x8xi1>, vector<8x8xf32>
    %cst_10 = arith.constant dense<0xFF800000> : vector<8xf32>
    %16 = vector.multi_reduction <maximumf>, %15, %cst_10 [1] : vector<8x8xf32> to vector<8xf32>
    %17 = vector.shape_cast %16 : vector<8xf32> to vector<8x1xf32>
    %18 = vector.broadcast %17 : vector<8x1xf32> to vector<8x8xf32>
    %19 = arith.subf %15, %18 : vector<8x8xf32>
    %20 = math.exp %19 : vector<8x8xf32>
    %cst_11 = arith.constant dense<0.000000e+00> : vector<8xf32>
    %21 = vector.multi_reduction <add>, %20, %cst_11 [1] : vector<8x8xf32> to vector<8xf32>
    %22 = vector.shape_cast %21 : vector<8xf32> to vector<8x1xf32>
    %23 = tpu.reciprocal %22 {approx = true} : vector<8x1xf32> -> vector<8x1xf32>
    %24 = vector.broadcast %23 : vector<8x1xf32> to vector<8x8xf32>
    %25 = arith.mulf %20, %24 : vector<8x8xf32>
    %26 = arith.truncf %25 : vector<8x8xf32> to vector<8x8xbf16>
    %27 = arith.truncf %6 : vector<8x128xf32> to vector<8x128xbf16>
    %cst_12 = arith.constant dense<0.000000e+00> : vector<8x128xf32>
    %28 = tpu.matmul %26, %27, %cst_12 {dimension_numbers = #tpu.dot_dimension_numbers<[1], [0], [0], [1], [0, 0, 1, 1], [], []>} : vector<8x8xbf16>, vector<8x128xbf16>, vector<8x128xf32> -> vector<8x128xf32>
    %29 = arith.addf %1, %28 : vector<8x128xf32>
    %30 = arith.truncf %29 : vector<8x128xf32> to vector<8x128xbf16>
    %c0_13 = arith.constant 0 : index
    %c0_14 = arith.constant 0 : index
    %31 = vector.load %arg4[%c0_13, %c0_14] : memref<128x128xbf16, #tpu.memory_space<vmem>>, vector<128x128xbf16>
    %cst_15 = arith.constant dense<0.000000e+00> : vector<8x128xf32>
    %32 = tpu.matmul %30, %31, %cst_15 {dimension_numbers = #tpu.dot_dimension_numbers<[1], [0], [0], [1], [0, 0, 1, 1], [], []>} : vector<8x128xbf16>, vector<128x128xbf16>, vector<8x128xf32> -> vector<8x128xf32>
    %cst_16 = arith.constant 0.000000e+00 : f32
    %33 = vector.broadcast %cst_16 : f32 to vector<8x128xf32>
    %34 = arith.maximumf %32, %33 : vector<8x128xf32>
    %35 = arith.truncf %34 : vector<8x128xf32> to vector<8x128xbf16>
    %c0_17 = arith.constant 0 : index
    %c0_18 = arith.constant 0 : index
    %36 = vector.load %arg5[%c0_17, %c0_18] : memref<128x128xbf16, #tpu.memory_space<vmem>>, vector<128x128xbf16>
    %cst_19 = arith.constant dense<0.000000e+00> : vector<8x128xf32>
    %37 = tpu.matmul %35, %36, %cst_19 {dimension_numbers = #tpu.dot_dimension_numbers<[1], [0], [0], [1], [0, 0, 1, 1], [], []>} : vector<8x128xbf16>, vector<128x128xbf16>, vector<8x128xf32> -> vector<8x128xf32>
    %38 = arith.addf %29, %37 : vector<8x128xf32>
    %c0_20 = arith.constant 0 : index
    %c0_21 = arith.constant 0 : index
    %c0_22 = arith.constant 0 : index
    %39 = vector.load %arg6[%c0_20, %c0_21, %c0_22] : memref<1x8x128xf32, #tpu.memory_space<vmem>>, vector<1x8x128xf32>
    %40 = vector.shape_cast %39 : vector<1x8x128xf32> to vector<8x128xf32>
    %41 = vector.shape_cast %38 : vector<8x128xf32> to vector<1x8x128xf32>
    tpu.vector_store %arg6[%c0_20, %c0_21, %c0_22], %41 {strides = array<i32>} : memref<1x8x128xf32, #tpu.memory_space<vmem>>, vector<1x8x128xf32>,
    return
  }
  func.func @transform_0(%arg0: i32) -> (i32, i32, i32) {
    %c0_i32 = arith.constant 0 : i32
    %c0_i32_0 = arith.constant 0 : i32
    %c0_i32_1 = arith.constant 0 : i32
    return %arg0, %c0_i32, %c0_i32_0 : i32, i32, i32
  }
  func.func @transform_1(%arg0: i32) -> (i32, i32) {
    %c0_i32 = arith.constant 0 : i32
    %c0_i32_0 = arith.constant 0 : i32
    %c0_i32_1 = arith.constant 0 : i32
    return %c0_i32, %c0_i32_0 : i32, i32
  }
  func.func @transform_2(%arg0: i32) -> (i32, i32) {
    %c0_i32 = arith.constant 0 : i32
    %c0_i32_0 = arith.constant 0 : i32
    %c0_i32_1 = arith.constant 0 : i32
    return %c0_i32, %c0_i32_0 : i32, i32
  }
  func.func @transform_3(%arg0: i32) -> (i32, i32) {
    %c0_i32 = arith.constant 0 : i32
    %c0_i32_0 = arith.constant 0 : i32
    %c0_i32_1 = arith.constant 0 : i32
    return %c0_i32, %c0_i32_0 : i32, i32
  }
  func.func @transform_4(%arg0: i32) -> (i32, i32) {
    %c0_i32 = arith.constant 0 : i32
    %c0_i32_0 = arith.constant 0 : i32
    %c0_i32_1 = arith.constant 0 : i32
    return %c0_i32, %c0_i32_0 : i32, i32
  }
  func.func @transform_5(%arg0: i32) -> (i32, i32, i32) {
    %c0_i32 = arith.constant 0 : i32
    %c0_i32_0 = arith.constant 0 : i32
    %c0_i32_1 = arith.constant 0 : i32
    return %arg0, %c0_i32, %c0_i32_0 : i32, i32, i32
  }
}

</mosaic_0001>

<bundles_post_ra>
// kernel: tpu_custom_call.1
= control target key start
LH: loop header
LB: loop body
LE: loop exit
PB: predicated region body
PF: predicated region fallthrough
CT: control target
= control target key end

     0   :  { %10 = vsyncpa [#allocation3], 0  ;;  %s1877_s0 = inlined_call_operand.hbm [shape: f32[2,8,128], index: 0, kind: input, shape index: {}]   ;;  %s1878_s1 = inlined_call_operand.hbm [shape: bf16[128,128], index: 1, kind: input, shape index: {}]   ;;  %s1879_s2 = inlined_call_operand.hbm [shape: bf16[128,128], index: 2, kind: input, shape index: {}]   ;;  %s1880_s3 = inlined_call_operand.hbm [shape: bf16[128,128], index: 3, kind: input, shape index: {}]   ;;  %s1881_s4 = inlined_call_operand.hbm [shape: bf16[128,128], index: 4, kind: input, shape index: {}]   ;;  %s1882_s5 = inlined_call_operand.hbm [shape: f32[2,8,128], index: 5, kind: output, shape index: {}]  }
   0x1   :  { %12 = vsyncpa [#allocation3 + $0x1], 0 }
   0x2   :  { %13 = vsyncpa [#allocation6], 0 }
   0x3   :  { %14 = vsyncpa [#allocation9], 0 }
   0x4   :  { %15 = vsyncpa [#allocation4], 0 }
   0x5   :  { %17 = vsyncpa [#allocation4 + $0x1], 0  ;;  %s1524_s18 = smov 0   ;;  %s1526_s19 = smov 0  }
   0x6   :  { %s1528_s20 = smov 0   ;;  %s1530_s21 = smov 0  }
   0x7 LB: > { %s1484_s22 = smov [#allocation5]   ;;  %s1545_s24 = sadd.s32 4294967295, %s1482_s21   ;;  %s1482_s21 = sphi %s1530_s21, %s1906_s21   ;;  %s1478_s20 = sphi %s1528_s20, %s1905_s20   ;;  %s1474_s19 = sphi %s1526_s19, %s1904_s19   ;;  %s1470_s18 = sphi %s1524_s18, %s1903_s18  }
   0x8   : > { %s176_s23 = sshll.u32 %s1484_s22, 4  ;;  %p955_p0 = scmp.ge.s32.totalorder %s1482_s21, 1  ;;  %s1550_s23 = int_to_ptr.vmem [resolvable:$true] %s176_s23 }
   0x9   : > { %p1883_p1 = scmp.eq.s32.totalorder %s1545_s24, 0  ;;  %p164_p2 = scmp.lt.s32.totalorder %s1482_s21, 3 }
   0xa   : > { %s1485_s26 = smov [#allocation8]   ;;  %s1486_s29 = smov [#allocation7]  }
   0xb   : > { %p1552_p3 = pnand %p955_p0, %p164_p2  ;;  %s202_s27 = sshll.u32 %s1485_s26, 4  ;;  %s1565_s27 = int_to_ptr.vmem [resolvable:$true] %s202_s27 }
   0xc   : > { %s189_s30 = sshll.u32 %s1486_s29, 4  ;;  %s1266_s8 = scalar_lea.hbm %s1878_s1, 1024  ;;  %s1567_s30 = int_to_ptr.vmem [resolvable:$true] %s189_s30 }
   0xd   : > { %s1886_s25 = scalar_select %p1552_p3, 1, 0 }
   0xe   : > { %p1159_p5 = pneg %p1552_p3  ;;  %p1267_p7 = scmp.ne.s32.totalorder %s1878_s1, %s1266_s8 }
   0xf   : > { %p1273_p11 = scmp.lt.u32.totalorder %s1266_s8, %s1878_s1 }
  0x10   : > { %p1561_p6 = pnand %p1159_p5, %p1883_p1 }
  0x12   : > { %p1577_p8 = pneg %p1561_p6 }
  0x14   : > { %p1269_p9 = pnand %p1577_p8, %p1267_p7 }
  0x16   : > { %p1270_p10 = pneg %p1269_p9 }
  0x18   : > { %p1275_p12 = pnand %p1273_p11, %p1270_p10 }
  0x1a   : > { %1278 = shalt.err (!%p1275_p12)
}
  0x1b   : > { %s1279_s14 = scalar_lea.vmem %s1550_s23, 1024  ;;  %p1287_p5 = scmp.lt.s32.totalorder %s1550_s23, %s1550_s23 }
  0x1c   : > { %p1280_p13 = scmp.ne.s32.totalorder %s1550_s23, %s1279_s14  ;;  %p1288_p4 = scmp.lt.s32.totalorder %s1279_s14, %s1279_s14 }
  0x1e   : > { %p1282_p0 = pnand %p1280_p13, %p1577_p8  ;;  %p1289_p7 = por %p1288_p4, %p1287_p5 }
  0x20   : > { %p1283_p2 = pneg %p1282_p0 }
  0x22   : > { %p1290_p9 = pnand %p1289_p7, %p1283_p2 }
  0x24   : > { %1293 = shalt.err (!%p1290_p9)
}
  0x25   : > { %s1487_s15 = smov 64   ;;  %s1488_s16 = smov 4  }
  0x26   : > { %1162 = dma.hbm_to_vmem [thread:$0]  (!%p1561_p6), %s1878_s1, 1024, %s1550_s23, [#allocation6], %s1487_s15, %s1487_s15, %s1488_s16  }
  0x27   : > { %s1294_s6 = scalar_lea.hbm %s1880_s3, 1024 }
  0x28   : > { %p1295_p4 = scmp.ne.s32.totalorder %s1880_s3, %s1294_s6  ;;  %p1301_p12 = scmp.lt.u32.totalorder %s1294_s6, %s1880_s3 }
  0x2a   : > { %p1297_p10 = pnand %p1295_p4, %p1577_p8 }
  0x2c   : > { %p1298_p11 = pneg %p1297_p10 }
  0x2e   : > { %p1303_p13 = pnand %p1301_p12, %p1298_p11 }
  0x30   : > { %1306 = shalt.err (!%p1303_p13)
}
  0x31   : > { %s1307_s23 = scalar_lea.vmem %s1565_s27, 1024  ;;  %p1315_p7 = scmp.lt.s32.totalorder %s1565_s27, %s1565_s27 }
  0x32   : > { %p1308_p0 = scmp.ne.s32.totalorder %s1565_s27, %s1307_s23  ;;  %p1316_p9 = scmp.lt.s32.totalorder %s1307_s23, %s1307_s23 }
  0x34   : > { %p1310_p2 = pnand %p1308_p0, %p1577_p8  ;;  %p1317_p4 = por %p1316_p9, %p1315_p7 }
  0x36   : > { %p1311_p5 = pneg %p1310_p2 }
  0x38   : > { %p1318_p10 = pnand %p1317_p4, %p1311_p5 }
  0x3a   : > { %1321 = shalt.err (!%p1318_p10)
}
  0x3b   : > { %1168 = dma.hbm_to_vmem [thread:$0]  (!%p1561_p6), %s1880_s3, 1024, %s1565_s27, [#allocation9], %s1487_s15, %s1487_s15, %s1488_s16  }
  0x3c   : > { %s1322_s22 = scalar_lea.hbm %s1879_s2, 1024 }
  0x3d   : > { %p1323_p11 = scmp.ne.s32.totalorder %s1879_s2, %s1322_s22  ;;  %p1329_p0 = scmp.lt.u32.totalorder %s1322_s22, %s1879_s2 }
  0x3f   : > { %p1325_p12 = pnand %p1323_p11, %p1577_p8 }
  0x41   : > { %p1326_p13 = pneg %p1325_p12 }
  0x43   : > { %p1331_p2 = pnand %p1329_p0, %p1326_p13 }
  0x45   : > { %1334 = shalt.err (!%p1331_p2)
}
  0x46   : > { %s1335_s27 = scalar_lea.vmem %s1567_s30, 1024  ;;  %p1343_p4 = scmp.lt.s32.totalorder %s1567_s30, %s1567_s30 }
  0x47   : > { %p1336_p5 = scmp.ne.s32.totalorder %s1567_s30, %s1335_s27  ;;  %p1344_p10 = scmp.lt.s32.totalorder %s1335_s27, %s1335_s27 }
  0x49   : > { %p1338_p7 = pnand %p1336_p5, %p1577_p8  ;;  %p1345_p11 = por %p1344_p10, %p1343_p4 }
  0x4b   : > { %p1339_p9 = pneg %p1338_p7 }
  0x4d   : > { %p1346_p12 = pnand %p1345_p11, %p1339_p9 }
  0x4f   : > { %1349 = shalt.err (!%p1346_p12)
}
  0x50   : > { %1165 = dma.hbm_to_vmem [thread:$0]  (!%p1561_p6), %s1879_s2, 1024, %s1567_s30, [#allocation6], %s1487_s15, %s1487_s15, %s1488_s16  }
  0x51   : > { %s1489_s10 = smov [#allocation10]   ;;  %s1350_s14 = scalar_lea.hbm %s1881_s4, 1024 }
  0x52   : > { %s215_s23 = sshll.u32 %s1489_s10, 4  ;;  %p1351_p13 = scmp.ne.s32.totalorder %s1881_s4, %s1350_s14  ;;  %s216_s23 = int_to_ptr.vmem [resolvable:$true] %s215_s23 }
  0x53   : > { %p1357_p5 = scmp.lt.u32.totalorder %s1350_s14, %s1881_s4 }
  0x54   : > { %p1353_p0 = pnand %p1351_p13, %p1577_p8 }
  0x56   : > { %p1354_p2 = pneg %p1353_p0 }
  0x58   : > { %p1359_p7 = pnand %p1357_p5, %p1354_p2 }
  0x5a   : > { %1362 = shalt.err (!%p1359_p7)
}
  0x5b   : > { %s1363_s30 = scalar_lea.vmem %s216_s23, 1024  ;;  %p1371_p11 = scmp.lt.s32.totalorder %s216_s23, %s216_s23 }
  0x5c   : > { %p1364_p9 = scmp.ne.s32.totalorder %s216_s23, %s1363_s30  ;;  %p1372_p12 = scmp.lt.s32.totalorder %s1363_s30, %s1363_s30 }
  0x5e   : > { %p1366_p4 = pnand %p1364_p9, %p1577_p8  ;;  %p1373_p1 = por %p1372_p12, %p1371_p11 }
  0x60   : > { %p1367_p10 = pneg %p1366_p4 }
  0x62   : > { %p1374_p3 = pnand %p1373_p1, %p1367_p10 }
  0x64   : > { %1377 = shalt.err (!%p1374_p3)
}
  0x65   : > { %1171 = dma.hbm_to_vmem [thread:$0]  (!%p1561_p6), %s1881_s4, 1024, %s216_s23, [#allocation9], %s1487_s15, %s1487_s15, %s1488_s16  }
  0x66   : > { %s954_s28 = sadd.s32 4294967294, %s1482_s21   ;;  %s1676_s11 = sadd.s32 1, %s1482_s21  }
  0x67   : > { %s27_s27 = ssub.s32 %s1482_s21, %s1676_s11  ;;  %s30_s8 = sadd.s32 1, %s1478_s20 }
  0x68   : > { %p28_p1 = scmp.eq.s32.totalorder %s27_s27, 0  ;;  %p37_p3 = scmp.ne.s32.totalorder %s1478_s20, %s1474_s19 }
  0x69   : > { %p38_p8 = scmp.eq.s32.totalorder %s1482_s21, 0  ;;  %p43_p13 = scmp.ne.s32.totalorder %s1474_s19, %s1470_s18 }
  0x6a   : > { %s1687_s9 = scalar_select %p28_p1, %s1478_s20, %s30_s8  }
  0x6b   : > { %p1689_p0 = por %p38_p8, %p37_p3  ;;  %p1890_p2 = scmp.eq.s32.totalorder %s1545_s24, 0 }
  0x6c   : > { %p151_p5 = scmp.eq.s32.totalorder %s1545_s24, 1  ;;  %p157_p7 = scmp.eq.s32.totalorder %s954_s28, 1 }
  0x6d   : > { %p1695_p6 = por %p1890_p2, %p43_p13  ;;  %p1184_p9 = scmp.lt.s32.totalorder %s1482_s21, 2 }
  0x6e   : > { %s229_s16 = sand.u32 1, %s1478_s20   ;;  %p1702_p4 = por %p151_p5, %p37_p3 }
  0x6f   : > { %p1706_p10 = por %p157_p7, %p43_p13  ;;  %s961_s13 = sshll.u32 %s229_s16, 3 }
  0x70   : > { %s1892_s23 = scalar_select %p1702_p4, 1, 0 }
  0x71   : > { %s1893_s12 = scalar_select %p1706_p10, 1, 0 }
  0x72   : > { %s962_s14 = sshll.u32 %s1482_s21, 7  ;;  %s233_s29 = scalar_lea.vmem [#allocation2], %s961_s13 }
  0x73   : > { %s1714_s26 = scalar_lea.hbm %s1877_s0, %s962_s14  ;;  %s240_s30 = sshll.u32 %s233_s29, 4  ;;  %s1716_s30 = int_to_ptr.vmem [resolvable:$true] %s240_s30 }
  0x74   : > { %p1720_p11 = pnand %p1184_p9, %p1689_p0  ;;  %s230_s7 = scalar_lea.sflag [#allocation3], %s229_s16 }
  0x75   : > { %s1378_s28 = scalar_lea.hbm %s1714_s26, 128  ;;  %s1383_s13 = scalar_lea.hbm %s1877_s0, 256 }
  0x76   : > { %p1379_p12 = scmp.ne.s32.totalorder %s1714_s26, %s1378_s28  ;;  %p1380_p1 = pneg %p1720_p11 }
  0x77   : > { %p1384_p13 = scmp.lt.u32.totalorder %s1714_s26, %s1877_s0  ;;  %p1385_p0 = scmp.lt.u32.totalorder %s1383_s13, %s1378_s28 }
  0x78   : > { %p1381_p3 = pnand %p1380_p1, %p1379_p12  ;;  %p1387_p5 = scmp.lt.u32.totalorder %s1378_s28, %s1714_s26 }
  0x79   : > { %p1386_p2 = por %p1385_p0, %p1384_p13 }
  0x7a   : > { %p1382_p8 = pneg %p1381_p3 }
  0x7b   : > { %p1388_p7 = por %p1387_p5, %p1386_p2 }
  0x7d   : > { %p1389_p9 = pnand %p1388_p7, %p1382_p8 }
  0x7f   : > { %1392 = shalt.err (!%p1389_p9)
}
  0x80   : > { %s1393_s16 = scalar_lea.vmem %s1716_s30, 128  ;;  %s1490_s17 = smov [#allocation2]  }
  0x81   : > { %p1394_p12 = scmp.ne.s32.totalorder %s1716_s30, %s1393_s16  ;;  %s1398_s22 = sshll.u32 %s1490_s17, 4  ;;  %s1399_s22 = int_to_ptr.vmem [resolvable:$false] %s1398_s22 }
  0x82   : > { %s1400_s29 = scalar_lea.vmem %s1399_s22, 256  ;;  %p1401_p4 = scmp.lt.s32.totalorder %s1716_s30, %s1399_s22 }
  0x83   : > { %p1396_p3 = pnand %p1394_p12, %p1380_p1  ;;  %p1402_p13 = scmp.lt.s32.totalorder %s1400_s29, %s1393_s16 }
  0x85   : > { %p1397_p10 = pneg %p1396_p3  ;;  %p1403_p0 = por %p1402_p13, %p1401_p4 }
  0x87   : > { %p1404_p2 = pnand %p1403_p0, %p1397_p10 }
  0x89   : > { %1407 = shalt.err (!%p1404_p2)
}
  0x8a   : > { %1175 = dma.hbm_to_vmem [thread:$0]  (!%p1720_p11), %s1714_s26, 128, %s1716_s30, %s230_s7  }
  0x8b   : > { %p1895_p8 = scmp.ne.s32.totalorder %s1886_s25, 0 }
  0x8c   : > { %s1752_s28 = sand.u32 (!%p1895_p8), 1, %s1474_s19  }
  0x8d   : > { %249 = sbr.rel (%p1895_p8) target bundleno = 1601 (0x641), region = 40  ;;  %s964_s27 = sshll.u32 (!%p1895_p8), %s1752_s28, 3 }
  0x8e   : > { %s252_s8 = scalar_lea.sflag (!%p1895_p8), [#allocation3], %s1752_s28  ;;  %s1758_s13 = scalar_lea.vmem (!%p1895_p8), [#allocation2], %s964_s27 }
  0x94   : > { %1453 = dma.done.wait (%p1695_p6), %s252_s8, 128  }
  0x95   : > { %1455 = vsyncadd (%p1695_p6), %s252_s8, 4294967168  ;;  %p1896_p4 = scmp.eq.s32.totalorder %s1545_s24, 0 }
  0x97   : > { %1457 = dma.done.wait (%p1896_p4), [#allocation6], 2048   ;;  %p1897_p10 = pmov %p1896_p4 }
  0x98   : > { %p1898_p11 = pmov %p1896_p4 }
  0x99   : > { %1459 = vsyncadd (%p1897_p10), [#allocation6], 4294965248 }
  0x9a   : > { %1461 = dma.done.wait (%p1898_p11), [#allocation9], 2048   ;;  %p1899_p1 = pmov %p1896_p4 }
  0x9b   : > { %v1491_v0 = vmov 0.0   ;;  %vm1492_vm0 = vmmov 0   ;;  %v1230_v1 = vld [vmem:[#allocation5] sm:$0xff]   ;;  %v1231_v2 = vld [vmem:[#allocation5 + $0x8] sm:$0xff]   ;;  %v1232_v3 = vld [vmem:[#allocation5 + $0x10] sm:$0xff]   ;;  %v551_v24 = vlaneseq  ;;  %vm557_vm2 = vcmask 64512  }
  0x9c   : > { %1463 = vsyncadd (%p1899_p1), [#allocation9], 4294965248  ;;  %1047 = vmatprep.subr.bf16.mxu0 %v1491_v0  ;;  %1063 = vmatprep.mubr.msk.bf16.mxu0 %vm1492_vm0, %v1491_v0  ;;  %v1233_v4 = vld [vmem:[#allocation5 + $0x18] sm:$0xff]   ;;  %v1234_v5 = vld [vmem:[#allocation5 + $0x20] sm:$0xff]   ;;  %vm574_vm3 = vcmask 1043456   ;;  %s1004_s25 = sshll.u32 %s1545_s24, 7 }
  0x9d   : > { %1067 = vmatprep.subr.bf16.mxu1 %v1491_v0  ;;  %1083 = vmatprep.mubr.msk.bf16.mxu1 %vm1492_vm0, %v1491_v0  ;;  %v1235_v6 = vld [vmem:[#allocation5 + $0x28] sm:$0xff]   ;;  %v1236_v7 = vld [vmem:[#allocation5 + $0x30] sm:$0xff]   ;;  %v1237_v8 = vld [vmem:[#allocation5 + $0x38] sm:$0xff]   ;;  %v552_v25 = vshrl.u32 %v551_v24, 7  ;;  %v554_v26 = vand.u32 127, %v551_v24  ;;  %s297_s15 = scalar_lea.vmem [#allocation11], %s964_s27  ;;  %s1833_s7 = scalar_lea.hbm %s1882_s5, %s1004_s25 }
  0x9e   : > { %1048 = vmatpush3.bf16.msra.mxu0 %v1230_v1  ;;  %v1785_v9 = vld [vmem:[%s1758_s13] sm:$0xff]  ;;  %v1238_v16 = vld [vmem:[#allocation7] sm:$0xff]   ;;  %v1239_v17 = vld [vmem:[#allocation7 + $0x8] sm:$0xff]   ;;  %s846_s26 = sshll.u32 %s297_s15, 4  ;;  %s833_s24 = scalar_lea.sflag [#allocation4], %s1752_s28  ;;  %s1835_s26 = int_to_ptr.vmem [resolvable:$true] %s846_s26 }
  0x9f   : > { %1049 = vmatprep.subr.bf16.mxu0 %v1491_v0  ;;  %v300_v10 = vpack.c.bf16 %v1785_v9, %v1785_v9  ;;  %1068 = vmatpush3.bf16.msra.mxu1 %v1238_v16  ;;  %v1240_v18 = vld [vmem:[#allocation7 + $0x10] sm:$0xff]   ;;  %v1241_v19 = vld [vmem:[#allocation7 + $0x18] sm:$0xff]   ;;  %v1242_v20 = vld [vmem:[#allocation7 + $0x20] sm:$0xff]   ;;  %vm555_vm1 = vcmp.ge.s32.totalorder %v552_v25, %v554_v26  ;;  %s1408_s10 = scalar_lea.vmem %s1835_s26, 128  ;;  %p1900_p5 = scmp.ne.s32.totalorder %s1892_s23, 0 }
  0xa0   : > { %1069 = vmatprep.subr.bf16.mxu1 %v1491_v0  ;;  %v1243_v21 = vld [vmem:[#allocation7 + $0x28] sm:$0xff]   ;;  %v1244_v22 = vld [vmem:[#allocation7 + $0x30] sm:$0xff]   ;;  %v1245_v23 = vld [vmem:[#allocation7 + $0x38] sm:$0xff]   ;;  %p1409_p6 = scmp.ne.s32.totalorder %s1835_s26, %s1408_s10  ;;  %s1493_s14 = smov [#allocation11]  }
  0xa1   : > { %v1246_v45 = vld [vmem:[#allocation8] sm:$0xff]   ;;  %v1247_v46 = vld [vmem:[#allocation8 + $0x8] sm:$0xff]   ;;  %v1248_v47 = vld [vmem:[#allocation8 + $0x10] sm:$0xff]   ;;  %s1412_s16 = sshll.u32 %s1493_s14, 4  ;;  %s1413_s16 = int_to_ptr.vmem [resolvable:$false] %s1412_s16 }
  0xa2   : > { %1050 = vmatpush3.bf16.msra.mxu0 %v1231_v2  ;;  %v1249_v48 = vld [vmem:[#allocation8 + $0x18] sm:$0xff]   ;;  %v1250_v49 = vld [vmem:[#allocation8 + $0x20] sm:$0xff]   ;;  %v1251_v50 = vld [vmem:[#allocation8 + $0x28] sm:$0xff]   ;;  %p1410_p7 = pnand %p1409_p6, %p1900_p5  ;;  %s1414_s17 = scalar_lea.vmem %s1413_s16, 256 }
  0xa3   : > { %1051 = vmatprep.subr.bf16.mxu0 %v1491_v0  ;;  %1070 = vmatpush3.bf16.msra.mxu1 %v1239_v17  ;;  %v1252_v51 = vld [vmem:[#allocation8 + $0x30] sm:$0xff]   ;;  %v1253_v56 = vld [vmem:[#allocation8 + $0x38] sm:$0xff]   ;;  %v1254_v57 = vld [vmem:[#allocation10] sm:$0xff]   ;;  %p1415_p12 = scmp.lt.s32.totalorder %s1835_s26, %s1413_s16  ;;  %p1416_p3 = scmp.lt.s32.totalorder %s1414_s17, %s1408_s10 }
  0xa4   : > { %1071 = vmatprep.subr.bf16.mxu1 %v1491_v0  ;;  %v1255_v58 = vld [vmem:[#allocation10 + $0x8] sm:$0xff]   ;;  %v1256_v59 = vld [vmem:[#allocation10 + $0x10] sm:$0xff]   ;;  %v1257_v60 = vld [vmem:[#allocation10 + $0x18] sm:$0xff]   ;;  %p1411_p9 = pneg %p1410_p7 }
  0xa5   : > { %v1258_v61 = vld [vmem:[#allocation10 + $0x20] sm:$0xff]   ;;  %v1259_v62 = vld [vmem:[#allocation10 + $0x28] sm:$0xff]   ;;  %v1260_v63 = vld [vmem:[#allocation10 + $0x30] sm:$0xff]   ;;  %p1417_p13 = por %p1416_p3, %p1415_p12 }
  0xa6   : > { %1052 = vmatpush3.bf16.msra.mxu0 %v1232_v3 }
  0xa7   : > { %1053 = vmatprep.subr.bf16.mxu0 %v1491_v0  ;;  %1072 = vmatpush3.bf16.msra.mxu1 %v1240_v18  ;;  %p1418_p0 = pnand %p1417_p13, %p1411_p9 }
  0xa8   : > { %1073 = vmatprep.subr.bf16.mxu1 %v1491_v0 }
  0xaa   : > { %1054 = vmatpush3.bf16.msra.mxu0 %v1233_v4 }
  0xab   : > { %1055 = vmatprep.subr.bf16.mxu0 %v1491_v0  ;;  %1074 = vmatpush3.bf16.msra.mxu1 %v1241_v19 }
  0xac   : > { %1075 = vmatprep.subr.bf16.mxu1 %v1491_v0 }
  0xae   : > { %1056 = vmatpush3.bf16.msra.mxu0 %v1234_v5 }
  0xaf   : > { %1057 = vmatprep.subr.bf16.mxu0 %v1491_v0  ;;  %1076 = vmatpush3.bf16.msra.mxu1 %v1242_v20 }
  0xb0   : > { %1077 = vmatprep.subr.bf16.mxu1 %v1491_v0 }
  0xb2   : > { %1058 = vmatpush3.bf16.msra.mxu0 %v1235_v6 }
  0xb3   : > { %1059 = vmatprep.subr.bf16.mxu0 %v1491_v0  ;;  %1078 = vmatpush3.bf16.msra.mxu1 %v1243_v21 }
  0xb4   : > { %1079 = vmatprep.subr.bf16.mxu1 %v1491_v0 }
  0xb6   : > { %1060 = vmatpush3.bf16.msra.mxu0 %v1236_v7  ;;  %v1261_v7 = vld [vmem:[#allocation10 + $0x38] sm:$0xff]  }
  0xb7   : > { %1061 = vmatprep.subr.bf16.mxu0 %v1491_v0  ;;  %1080 = vmatpush3.bf16.msra.mxu1 %v1244_v22 }
  0xb8   : > { %1081 = vmatprep.subr.bf16.mxu1 %v1491_v0 }
  0xba   : > { %1062 = vmatpush3.bf16.msra.mxu0 %v1237_v8 }
  0xbb   : > { %1087 = vmatprep.subr.bf16.mxu0 %v1491_v0  ;;  %1082 = vmatpush3.bf16.msra.mxu1 %v1245_v23 }
  0xbc   : > { %1093 = vmatprep.subr.bf16.mxu1 %v1491_v0 }
  0xbd   : > { %1064 = vmatmul.mubr.bf16.vlgmr.msra.gmra.mrb[0].mxu0 %v300_v10 }
  0xbe   : > { %1089 = vmatprep.mubr.msk.bf16.mxu0 %vm1492_vm0, %v1491_v0  ;;  %1084 = vmatmul.mubr.bf16.vlgmr.msra.gmra.mrb[0].mxu1 %v300_v10 }
  0xbf   : > { %1095 = vmatprep.mubr.msk.bf16.mxu1 %vm1492_vm0, %v1491_v0 }
 0x190   : > { %v399_v11 = vpop.f32.mrb[0].mxu0 }
 0x191   : > { %v509_v12 = vpack.c.bf16 %v399_v11, %v399_v11  ;;  %v1065_v13 = vpop.f32.mrb[1].mxu0  ;;  %v503_v39 = vpop.f32.mrb[0].mxu1 }
 0x192   : > { %v402_v14 = vpop.f32.mrb[2].mxu0  ;;  %v1085_v40 = vpop.f32.mrb[1].mxu1  ;;  %v570_v43 = vpack.c.bf16 %v503_v39, %v503_v39 }
 0x193   : > { %v1066_v15 = vpop.f32.mrb[3].mxu0  ;;  %1088 = vmatpush3.bf16.xpose.msra.mxu0 %v509_v12  ;;  %v506_v41 = vpop.f32.mrb[2].mxu1 }
 0x194   : > { %1099 = vmatprep.subr.bf16.mxu0 %v1491_v0  ;;  %v1086_v42 = vpop.f32.mrb[3].mxu1  ;;  %v576_v44 = vsel %vm574_vm3, %v570_v43, 0 }
 0x195   : > { %1094 = vmatpush3.bf16.msra.mxu1 %v576_v44 }
 0x196   : > { %1119 = vmatprep.subr.bf16.mxu1 %v1491_v0 }
 0x19a   : > { %1090 = vmatmul.mubr.bf16.vlgmr.msra.gmra.mrb[4].mxu0 %v300_v10 }
 0x19b   : > { %1115 = vmatprep.mubr.msk.bf16.mxu0 %vm1492_vm0, %v1491_v0  ;;  %1100 = vmatpush3.bf16.msra.mxu0 %v1246_v45 }
 0x19c   : > { %1101 = vmatprep.subr.bf16.mxu0 %v1491_v0 }
 0x19f   : > { %1102 = vmatpush3.bf16.msra.mxu0 %v1247_v46 }
 0x1a0   : > { %1103 = vmatprep.subr.bf16.mxu0 %v1491_v0 }
 0x1a3   : > { %1104 = vmatpush3.bf16.msra.mxu0 %v1248_v47 }
 0x1a4   : > { %1105 = vmatprep.subr.bf16.mxu0 %v1491_v0 }
 0x1a7   : > { %1106 = vmatpush3.bf16.msra.mxu0 %v1249_v48 }
 0x1a8   : > { %1107 = vmatprep.subr.bf16.mxu0 %v1491_v0 }
 0x1ab   : > { %1108 = vmatpush3.bf16.msra.mxu0 %v1250_v49 }
 0x1ac   : > { %1109 = vmatprep.subr.bf16.mxu0 %v1491_v0 }
 0x1af   : > { %1110 = vmatpush3.bf16.msra.mxu0 %v1251_v50 }
 0x1b0   : > { %1111 = vmatprep.subr.bf16.mxu0 %v1491_v0 }
 0x1b3   : > { %1112 = vmatpush3.bf16.msra.mxu0 %v1252_v51 }
 0x1b4   : > { %1113 = vmatprep.subr.bf16.mxu0 %v1491_v0 }
 0x1b7   : > { %1114 = vmatpush3.bf16.msra.mxu0 %v1253_v56 }
 0x26d   : > { %v544_v27 = vpop.f32.mrb[4].mxu0 }
 0x26e   : > { %v550_v28 = vmul.f32 0.17677669, %v544_v27  ;;  %v1091_v29 = vpop.f32.mrb[5].mxu0 }
 0x26f   : > { %v547_v30 = vpop.f32.mrb[6].mxu0 }
 0x270   : > { %v1092_v31 = vpop.f32.mrb[7].mxu0  ;;  %v556_v32 = vsel %vm555_vm1, %v550_v28, -inf }
 0x271   : > { %v558_v33 = vsel %vm557_vm2, %v556_v32, -inf }
 0x272   : > { %559 = vmax.xlane.f32.xlu0 %v558_v33 }
 0x2ff   : > { %v560_v34 = vpop.xlane.xlu0 %559 }
 0x300   : > { %v561_v35 = vsub.f32 %v556_v32, %v560_v34 }
 0x302   : > { %v562_v36 = vmul.f32 1.442695, %v561_v35 }
 0x304   : > { %1262 = vpow2.f32 %v562_v36 }
 0x30e   : > { %v1263_v37 = vpop.eup %1262 }
 0x30f   : > { %v564_v38 = vsel %vm557_vm2, %v1263_v37, 0.0 }
 0x310   : > { %565 = vadd.xlane.f32.xlu0 %v564_v38 }
 0x39d   : > { %v566_v52 = vpop.xlane.xlu0 %565 }
 0x39e   : > { %1264 = vrcp.f32 %v566_v52 }
 0x3a8   : > { %v1265_v53 = vpop.eup %1264 }
 0x3a9   : > { %v568_v54 = vmul.f32 %v1265_v53, %v1263_v37 }
 0x3ab   : > { %v569_v55 = vpack.c.bf16 %v568_v54, %v568_v54 }
 0x3ad   : > { %1096 = vmatmul.mubr.msk.bf16.vlgmr.msra.gmra.mrb[4].mxu1 %vm557_vm2, %v569_v55 }
 0x3ae   : > { %1135 = vmatprep.mubr.msk.bf16.mxu1 %vm1492_vm0, %v1491_v0  ;;  %1120 = vmatpush3.bf16.msra.mxu1 %v1254_v57 }
 0x3af   : > { %1121 = vmatprep.subr.bf16.mxu1 %v1491_v0 }
 0x3b2   : > { %1122 = vmatpush3.bf16.msra.mxu1 %v1255_v58 }
 0x3b3   : > { %1123 = vmatprep.subr.bf16.mxu1 %v1491_v0 }
 0x3b6   : > { %1124 = vmatpush3.bf16.msra.mxu1 %v1256_v59 }
 0x3b7   : > { %1125 = vmatprep.subr.bf16.mxu1 %v1491_v0 }
 0x3ba   : > { %1126 = vmatpush3.bf16.msra.mxu1 %v1257_v60 }
 0x3bb   : > { %1127 = vmatprep.subr.bf16.mxu1 %v1491_v0 }
 0x3be   : > { %1128 = vmatpush3.bf16.msra.mxu1 %v1258_v61 }
 0x3bf   : > { %1129 = vmatprep.subr.bf16.mxu1 %v1491_v0 }
 0x3c2   : > { %1130 = vmatpush3.bf16.msra.mxu1 %v1259_v62 }
 0x3c3   : > { %1131 = vmatprep.subr.bf16.mxu1 %v1491_v0 }
 0x3c6   : > { %1132 = vmatpush3.bf16.msra.mxu1 %v1260_v63 }
 0x3c7   : > { %1133 = vmatprep.subr.bf16.mxu1 %v1491_v0 }
 0x3ca   : > { %1134 = vmatpush3.bf16.msra.mxu1 %v1261_v7 }
 0x480   : > { %v612_v1 = vpop.f32.mrb[4].mxu1 }
 0x481   : > { %v618_v2 = vadd.f32 %v612_v1, %v1785_v9  ;;  %v1097_v3 = vpop.f32.mrb[5].mxu1 }
 0x482   : > { %v615_v4 = vpop.f32.mrb[6].mxu1 }
 0x483   : > { %v619_v5 = vpack.c.bf16 %v618_v2, %v618_v2  ;;  %v1098_v6 = vpop.f32.mrb[7].mxu1 }
 0x485   : > { %1116 = vmatmul.mubr.bf16.vlgmr.msra.gmra.mrb[8].mxu0 %v619_v5 }
 0x558   : > { %v718_v8 = vpop.f32.mrb[8].mxu0 }
 0x559   : > { %v724_v10 = vmax.f32 %v718_v8, 0.0  ;;  %v1117_v11 = vpop.f32.mrb[9].mxu0 }
 0x55a   : > { %v721_v12 = vpop.f32.mrb[10].mxu0 }
 0x55b   : > { %v725_v13 = vpack.c.bf16 %v724_v10, %v724_v10  ;;  %v1118_v14 = vpop.f32.mrb[11].mxu0 }
 0x55d   : > { %1136 = vmatmul.mubr.bf16.vlgmr.msra.gmra.mrb[8].mxu1 %v725_v13 }
 0x630   : > { %v824_v0 = vpop.f32.mrb[8].mxu1 }
 0x631   : > { %v830_v9 = vadd.f32 %v824_v0, %v618_v2  ;;  %v1137_v15 = vpop.f32.mrb[9].mxu1 }
 0x632   : > { %v827_v16 = vpop.f32.mrb[10].mxu1 }
 0x633   : > { %831 = vst [vmem:[%s297_s15] sm:$0xff] %v830_v9  ;;  %v1138_v17 = vpop.f32.mrb[11].mxu1 }
 0x634   : > { %1421 = shalt.err (!%p1418_p0)
}
 0x635   : > { %s1422_s22 = scalar_lea.hbm %s1833_s7, 128  ;;  %s1426_s27 = scalar_lea.hbm %s1882_s5, 256 }
 0x636   : > { %p1423_p2 = scmp.ne.s32.totalorder %s1833_s7, %s1422_s22  ;;  %p1427_p10 = scmp.lt.u32.totalorder %s1833_s7, %s1882_s5 }
 0x637   : > { %p1428_p11 = scmp.lt.u32.totalorder %s1426_s27, %s1422_s22  ;;  %p1430_p6 = scmp.lt.u32.totalorder %s1422_s22, %s1833_s7 }
 0x638   : > { %p1424_p8 = pnand %p1423_p2, %p1900_p5 }
 0x639   : > { %p1429_p1 = por %p1428_p11, %p1427_p10 }
 0x63a   : > { %p1425_p4 = pneg %p1424_p8 }
 0x63b   : > { %p1431_p7 = por %p1430_p6, %p1429_p1 }
 0x63d   : > { %p1432_p9 = pnand %p1431_p7, %p1425_p4 }
 0x63f   : > { %1435 = shalt.err (!%p1432_p9)
}
 0x640   : > { %1157 = dma.vmem_to_hbm [thread:$0]  (%p1900_p5), %s1835_s26, 128, %s1833_s7, %s833_s24  }
 0x641 PF: > { %s858_s25 = sand.u32 1, %s1470_s18   ;;  %p1901_p12 = scmp.ne.s32.totalorder %s1893_s12, 0 }
 0x642   : > { %p1902_p3 = scmp.ge.s32.totalorder %s1482_s21, 2  ;;  %s859_s15 = scalar_lea.sflag [#allocation4], %s858_s25 }
 0x644   : > { %p1177_p13 = pnand %p1902_p3, %p1901_p12 }
 0x646   : > { %1465 = dma.done.wait (!%p1177_p13), %s859_s15, 128  }
 0x647   : > { %1467 = vsyncadd (!%p1177_p13), %s859_s15, 4294967168  ;;  %p20_p0 = scmp.ge.s32.totalorder %s1676_s11, 4   ;;  %s1903_s18 = smov %s1474_s19 }
 0x648   : > { %s1904_s19 = smov %s1478_s20  ;;  %s1905_s20 = smov %s1687_s9 }
 0x649   : > { %s1906_s21 = smov %s1676_s11  ;;  %22 = sbr.rel (!%p20_p0) target bundleno = 7 (0x7), region = 101 }
 0x650   :  { %864 = vsyncpa [#allocation3], 1 }
 0x651   :  { %866 = vsyncpa [#allocation3 + $0x1], 1 }
 0x652   :  { %867 = vsyncpa [#allocation6], 1 }
 0x653   :  { %868 = vsyncpa [#allocation9], 1 }
 0x654   :  { %869 = vsyncpa [#allocation4], 1 }
 0x655   :  { %871 = vsyncpa [#allocation4 + $0x1], 1 }

</bundles_post_ra>
